<compile_context>
chip_gen: v6e
topology: v6e:2x2x1
jax: 0.10.0
libtpu: 0.0.40
codegen_flags: <defaults>
</compile_context>

<pallas_src>
import functools

import jax
import jax.numpy as jnp
from jax.experimental import pallas as pl
from jax.experimental.pallas import tpu as pltpu


def _cdiv(a, b):
    return -(-a // b)


# ---------------------------------------------------------------------------
# Fused single-pass kernel: whole (B, C, HW) image slab resident in VMEM.
# ---------------------------------------------------------------------------
def _se_fused_kernel(x_ref, w1t_ref, b1_ref, w2t_ref, b2_ref, o_ref):
    # Squeeze: lane-axis sum accumulated in f32 (1/HW folded into w1t).
    pooled = jnp.sum(x_ref[...], axis=-1, dtype=jnp.float32)            # (B, C)

    # Excite: fc1 -> relu -> fc2 -> sigmoid, batched over B (MXU-friendly).
    h = jnp.dot(pooled.astype(w1t_ref.dtype), w1t_ref[...],
                preferred_element_type=jnp.float32)
    h = jnp.maximum(h + b1_ref[...], 0.0)                               # (B, hid)
    s = jnp.dot(h.astype(w2t_ref.dtype), w2t_ref[...],
                preferred_element_type=jnp.float32)
    s = jax.nn.sigmoid(s + b2_ref[...])                                 # (B, C)

    # Scale: re-read x from VMEM (no long-lived upcast slab), multiply in the
    # I/O dtype.
    o_ref[...] = x_ref[...] * s.astype(o_ref.dtype)[:, :, None]


# ---------------------------------------------------------------------------
# Two-pass fallback (one image does not fit VMEM): gate pass + rescale pass.
# ---------------------------------------------------------------------------
def _gate_kernel(x_ref, w1t_ref, b1_ref, w2t_ref, b2_ref, g_ref, *, hw, t):
    j = pl.program_id(1)

    @pl.when(j == 0)
    def _():
        g_ref[...] = jnp.zeros_like(g_ref)

    # Mask the ragged last spatial chunk so garbage never enters the sum.
    col = jax.lax.broadcasted_iota(jnp.int32, x_ref.shape, 2)
    xs = jnp.where(j * t + col < hw, x_ref[...], 0)
    g_ref[...] += jnp.sum(xs, axis=-1, dtype=jnp.float32).reshape(g_ref.shape)

    @pl.when(j == pl.num_programs(1) - 1)
    def _():
        pooled = g_ref[...].reshape(1, g_ref.shape[2])                  # (1, C)
        h = jnp.dot(pooled.astype(w1t_ref.dtype), w1t_ref[...],
                    preferred_element_type=jnp.float32)
        h = jnp.maximum(h + b1_ref[...], 0.0)
        s = jnp.dot(h.astype(w2t_ref.dtype), w2t_ref[...],
                    preferred_element_type=jnp.float32)
        s = jax.nn.sigmoid(s + b2_ref[...])
        g_ref[...] = s.reshape(g_ref.shape)


def _scale_kernel(x_ref, g_ref, o_ref):
    g = g_ref[...].reshape(g_ref.shape[0], g_ref.shape[2])              # (1, C)
    o_ref[...] = x_ref[...] * g.astype(o_ref.dtype)[:, :, None]


def _se_two_pass(x3, w1t, b1r, w2t, b2r, out_dtype, vmem_limit, itemsize,
                 chunk_budget_bytes):
    N, C, HW = x3.shape
    hid = w1t.shape[1]

    # Spatial chunk: a multiple of 128 lanes (or full extent), sized so that
    # in/out blocks double-buffered + weights fit the VMEM limit.
    t_budget = max(chunk_budget_bytes // (C * itemsize), 128)
    T = max(128, (t_budget // 128) * 128)
    if T >= HW:
        T = HW
    n_hw = _cdiv(HW, T)

    gate = pl.pallas_call(
        functools.partial(_gate_kernel, hw=HW, t=T),
        out_shape=jax.ShapeDtypeStruct((N, 1, C), jnp.float32),
        grid_spec=pltpu.PrefetchScalarGridSpec(
            num_scalar_prefetch=0,
            grid=(N, n_hw),
            in_specs=[
                pl.BlockSpec((1, C, T), lambda i, j: (i, 0, j)),
                pl.BlockSpec((C, hid), lambda i, j: (0, 0)),
                pl.BlockSpec((1, hid), lambda i, j: (0, 0)),
                pl.BlockSpec((hid, C), lambda i, j: (0, 0)),
                pl.BlockSpec((1, C), lambda i, j: (0, 0)),
            ],
            out_specs=pl.BlockSpec((1, 1, C), lambda i, j: (i, 0, 0)),
        ),
        compiler_params=pltpu.CompilerParams(
            dimension_semantics=("parallel", "arbitrary"),
            vmem_limit_bytes=vmem_limit),
    )(x3, w1t, b1r, w2t, b2r)

    out3 = pl.pallas_call(
        _scale_kernel,
        out_shape=jax.ShapeDtypeStruct((N, C, HW), out_dtype),
        grid_spec=pltpu.PrefetchScalarGridSpec(
            num_scalar_prefetch=0,
            grid=(N, n_hw),
            in_specs=[
                pl.BlockSpec((1, C, T), lambda i, j: (i, 0, j)),
                pl.BlockSpec((1, 1, C), lambda i, j: (i, 0, 0)),
            ],
            out_specs=pl.BlockSpec((1, C, T), lambda i, j: (i, 0, j)),
        ),
        compiler_params=pltpu.CompilerParams(
            dimension_semantics=("parallel", "parallel"),
            vmem_limit_bytes=vmem_limit),
    )(x3, gate)
    return out3


# ---------------------------------------------------------------------------
# Host-side sizing helpers.
# ---------------------------------------------------------------------------
def _vmem_limit_bytes():
    cap = 64 * 1024 * 1024                      # conservative: v7x per-TC VMEM
    try:
        info = pltpu.get_tpu_info()
        cap = int(getattr(info, "vmem_capacity_bytes", cap))
    except Exception:
        pass
    if cap >= 100 * 1024 * 1024:                # v5e / v6e: 128 MiB physical
        return 100 * 1024 * 1024
    return max(32 * 1024 * 1024, min(cap - (8 << 20), 56 * 1024 * 1024))


def _pick_block_batch(n, per_image_bytes, budget_bytes):
    """Largest batch-block fitting the budget, keeping >=2 (pref. even) steps."""
    b = max(1, min(n, budget_bytes // max(per_image_bytes, 1)))
    if n >= 2:
        b = min(b, _cdiv(n, 2))                 # >= 2 grid steps (v7x: 2 TCs)
        g = _cdiv(n, b)
        if g % 2 == 1:
            b = max(1, _cdiv(n, g + 1))         # prefer an even step count
    return b


# ---------------------------------------------------------------------------
# Public wrapper.
# ---------------------------------------------------------------------------
@functools.partial(jax.jit, static_argnames=("block_budget_bytes",
                                             "force_two_pass"))
def squeeze_excite_pallas(x_nchw, w1, b1, w2, b2, *,
                          block_budget_bytes=None, force_two_pass=False):
    """x_nchw: (N, C, H, W).  w1: (hid, C), b1: (hid,), w2: (C, hid), b2: (C,)."""
    N, C, H, W = x_nchw.shape
    HW = H * W
    hid = w1.shape[0]
    itemsize = jnp.dtype(x_nchw.dtype).itemsize

    # Free reshape; no pad and no trailing slice (no extra HBM passes).
    x3 = x_nchw.reshape(N, C, HW)

    # bf16 MXU inputs only when the data itself is bf16; f32 path stays exact.
    fc_dtype = jnp.bfloat16 if x_nchw.dtype == jnp.bfloat16 else jnp.float32

    # Fold 1/HW into fc1's weight; pre-transpose so the kernel does
    # (B,C)@(C,hid) and (B,hid)@(hid,C) directly.
    w1t = (w1.astype(jnp.float32) / jnp.float32(HW)).T.astype(fc_dtype)  # (C,hid)
    w2t = w2.astype(jnp.float32).T.astype(fc_dtype)                      # (hid,C)
    b1r = b1.astype(jnp.float32).reshape(1, hid)
    b2r = b2.astype(jnp.float32).reshape(1, C)

    vmem_limit = _vmem_limit_bytes()
    weight_bytes = 2 * ((w1t.size + w2t.size) * jnp.dtype(fc_dtype).itemsize
                        + (b1r.size + b2r.size) * 4)
    if block_budget_bytes is None:
        # in + out blocks, double-buffered => 4x the input-block bytes.
        block_budget_bytes = max((vmem_limit - weight_bytes - (4 << 20)) // 4,
                                 1 << 20)

    per_image = C * HW * itemsize
    if force_two_pass or per_image > block_budget_bytes:
        # A single image does not fit the fused-kernel VMEM budget: two-pass
        # fallback (gate pass with an 'arbitrary' HW axis, then rescale pass).
        out3 = _se_two_pass(x3, w1t, b1r, w2t, b2r, x_nchw.dtype, vmem_limit,
                            itemsize, block_budget_bytes)
        return out3.reshape(N, C, H, W)

    B = _pick_block_batch(N, per_image, block_budget_bytes)
    grid = (_cdiv(N, B),)

    cost = pl.CostEstimate(
        flops=3 * N * C * HW + 4 * N * C * hid,
        transcendentals=N * C,
        bytes_accessed=2 * N * C * HW * itemsize + weight_bytes,
    )

    out3 = pl.pallas_call(
        _se_fused_kernel,
        out_shape=jax.ShapeDtypeStruct((N, C, HW), x_nchw.dtype),
        grid_spec=pltpu.PrefetchScalarGridSpec(
            num_scalar_prefetch=0,
            grid=grid,
            in_specs=[
                pl.BlockSpec((B, C, HW), lambda i: (i, 0, 0)),   # x slab
                pl.BlockSpec((C, hid),   lambda i: (0, 0)),      # fc1 weight^T/HW
                pl.BlockSpec((1, hid),   lambda i: (0, 0)),      # fc1 bias
                pl.BlockSpec((hid, C),   lambda i: (0, 0)),      # fc2 weight^T
                pl.BlockSpec((1, C),     lambda i: (0, 0)),      # fc2 bias
            ],
            out_specs=pl.BlockSpec((B, C, HW), lambda i: (i, 0, 0)),
        ),
        compiler_params=pltpu.CompilerParams(
            dimension_semantics=("parallel",),
            vmem_limit_bytes=vmem_limit),
        cost_estimate=cost,
    )(x3, w1t, b1r, w2t, b2r)

    return out3.reshape(N, C, H, W)


def squeeze_excite_ref(x, w1, b1, w2, b2):
    """Plain-JAX reference matching the PyTorch forward exactly."""
    pooled = jnp.mean(x, axis=(2, 3))                       # (N, C)
    h = jnp.maximum(pooled @ w1.T + b1, 0.0)                # (N, hid)
    s = jax.nn.sigmoid(h @ w2.T + b2)                       # (N, C)
    return x * s[:, :, None, None]


if __name__ == "__main__":
    # Shapes consistent with the module: reduction_ratio=16 -> in_channels=64,
    # hidden = 64 // 16 = 4.  Input: batch=2, 64 channels, 16x16 spatial.
    N, C, H, W = 2, 64, 16, 16
    reduction_ratio = 16
    hid = C // reduction_ratio

    key = jax.random.PRNGKey(0)
    kx, k1, k2, k3, k4 = jax.random.split(key, 5)

    x = jax.random.normal(kx, (N, C, H, W), dtype=jnp.float32)

    # Deterministic parameter init (nn.Linear-style uniform +/- 1/sqrt(fan_in)).
    bound1 = 1.0 / jnp.sqrt(jnp.float32(C))
    w1 = jax.random.uniform(k1, (hid, C), jnp.float32, -bound1, bound1)
    b1 = jax.random.uniform(k2, (hid,), jnp.float32, -bound1, bound1)
    bound2 = 1.0 / jnp.sqrt(jnp.float32(hid))
    w2 = jax.random.uniform(k3, (C, hid), jnp.float32, -bound2, bound2)
    b2 = jax.random.uniform(k4, (C,), jnp.float32, -bound2, bound2)

    # Fused single-pass path.
    ref = squeeze_excite_ref(x, w1, b1, w2, b2)
    out = jax.block_until_ready(squeeze_excite_pallas(x, w1, b1, w2, b2))
    assert out.shape == (N, C, H, W)
    assert jnp.allclose(out, ref, atol=1e-5, rtol=1e-5), "fused path mismatch"

    # Non-multiple-of-128 spatial size + ragged batch (no host pad/slice).
    x2 = jax.random.normal(kx, (3, C, 14, 14), dtype=jnp.float32)
    ref2 = squeeze_excite_ref(x2, w1, b1, w2, b2)
    out2 = jax.block_until_ready(squeeze_excite_pallas(x2, w1, b1, w2, b2))
    assert jnp.allclose(out2, ref2, atol=1e-5, rtol=1e-5), "ragged path mismatch"

    # Exercise the two-pass HW-split fallback (forced with a tiny budget).
    out3 = jax.block_until_ready(
        squeeze_excite_pallas(x, w1, b1, w2, b2,
                              block_budget_bytes=32 * 1024,
                              force_two_pass=True))
    assert jnp.allclose(out3, ref, atol=1e-5, rtol=1e-5), "two-pass mismatch"

    print("KERNEL_OK")
</pallas_src>

<mosaic_0001>
module attributes {stable_mosaic.version = 11 : i64} {
  func.func @_se_fused_kernel(%arg0: i32, %arg1: memref<1x64x256xf32, #tpu.memory_space<vmem>>, %arg2: memref<64x4xf32, #tpu.memory_space<vmem>>, %arg3: memref<1x4xf32, #tpu.memory_space<vmem>>, %arg4: memref<4x64xf32, #tpu.memory_space<vmem>>, %arg5: memref<1x64xf32, #tpu.memory_space<vmem>>, %arg6: memref<1x64x256xf32, #tpu.memory_space<vmem>>) attributes {dimension_semantics = [#tpu.dimension_semantics<parallel>], iteration_bounds = array<i64: 2>, scalar_prefetch = 0 : i64, scratch_operands = 0 : i64, tpu.core_type = #tpu.core_type<tc>, window_params = [{transform_indices = @transform_0, window_bounds = array<i64: 1, 64, 256>}, {pipeline_mode = #tpu.pipeline_mode<synchronous>, transform_indices = @transform_1, window_bounds = array<i64: 64, 4>}, {pipeline_mode = #tpu.pipeline_mode<synchronous>, transform_indices = @transform_2, window_bounds = array<i64: 1, 4>}, {pipeline_mode = #tpu.pipeline_mode<synchronous>, transform_indices = @transform_3, window_bounds = array<i64: 4, 64>}, {pipeline_mode = #tpu.pipeline_mode<synchronous>, transform_indices = @transform_4, window_bounds = array<i64: 1, 64>}, {transform_indices = @transform_5, window_bounds = array<i64: 1, 64, 256>}]} {
    %c0 = arith.constant 0 : index
    %c0_0 = arith.constant 0 : index
    %c0_1 = arith.constant 0 : index
    %0 = vector.load %arg1[%c0, %c0_0, %c0_1] : memref<1x64x256xf32, #tpu.memory_space<vmem>>, vector<1x64x256xf32>
    %cst = arith.constant dense<0.000000e+00> : vector<1x64xf32>
    %1 = vector.multi_reduction <add>, %0, %cst [2] : vector<1x64x256xf32> to vector<1x64xf32>
    %c0_2 = arith.constant 0 : index
    %c0_3 = arith.constant 0 : index
    %2 = vector.load %arg2[%c0_2, %c0_3] : memref<64x4xf32, #tpu.memory_space<vmem>>, vector<64x4xf32>
    %cst_4 = arith.constant dense<0.000000e+00> : vector<1x4xf32>
    %3 = tpu.matmul %1, %2, %cst_4 {dimension_numbers = #tpu.dot_dimension_numbers<[1], [0], [0], [1], [0, 0, 1, 1], [], []>} : vector<1x64xf32>, vector<64x4xf32>, vector<1x4xf32> -> vector<1x4xf32>
    %c0_5 = arith.constant 0 : index
    %c0_6 = arith.constant 0 : index
    %4 = vector.load %arg3[%c0_5, %c0_6] : memref<1x4xf32, #tpu.memory_space<vmem>>, vector<1x4xf32>
    %5 = arith.addf %3, %4 : vector<1x4xf32>
    %cst_7 = arith.constant 0.000000e+00 : f32
    %6 = vector.broadcast %cst_7 : f32 to vector<1x4xf32>
    %7 = arith.maximumf %5, %6 : vector<1x4xf32>
    %c0_8 = arith.constant 0 : index
    %c0_9 = arith.constant 0 : index
    %8 = vector.load %arg4[%c0_8, %c0_9] : memref<4x64xf32, #tpu.memory_space<vmem>>, vector<4x64xf32>
    %cst_10 = arith.constant dense<0.000000e+00> : vector<1x64xf32>
    %9 = tpu.matmul %7, %8, %cst_10 {dimension_numbers = #tpu.dot_dimension_numbers<[1], [0], [0], [1], [0, 0, 1, 1], [], []>} : vector<1x4xf32>, vector<4x64xf32>, vector<1x64xf32> -> vector<1x64xf32>
    %c0_11 = arith.constant 0 : index
    %c0_12 = arith.constant 0 : index
    %10 = vector.load %arg5[%c0_11, %c0_12] : memref<1x64xf32, #tpu.memory_space<vmem>>, vector<1x64xf32>
    %11 = arith.addf %9, %10 : vector<1x64xf32>
    %12 = arith.negf %11 : vector<1x64xf32>
    %13 = math.exp %12 : vector<1x64xf32>
    %cst_13 = arith.constant 1.000000e+00 : f32
    %14 = vector.broadcast %cst_13 : f32 to vector<1x64xf32>
    %15 = arith.addf %14, %13 : vector<1x64xf32>
    %16 = arith.divf %14, %15 : vector<1x64xf32>
    %c0_14 = arith.constant 0 : index
    %c0_15 = arith.constant 0 : index
    %c0_16 = arith.constant 0 : index
    %17 = vector.load %arg1[%c0_14, %c0_15, %c0_16] : memref<1x64x256xf32, #tpu.memory_space<vmem>>, vector<1x64x256xf32>
    %18 = vector.shape_cast %16 : vector<1x64xf32> to vector<1x64x1xf32>
    %19 = vector.broadcast %18 : vector<1x64x1xf32> to vector<1x64x256xf32>
    %20 = arith.mulf %17, %19 : vector<1x64x256xf32>
    %c0_17 = arith.constant 0 : index
    %c0_18 = arith.constant 0 : index
    %c0_19 = arith.constant 0 : index
    %21 = vector.load %arg6[%c0_17, %c0_18, %c0_19] : memref<1x64x256xf32, #tpu.memory_space<vmem>>, vector<1x64x256xf32>
    tpu.vector_store %arg6[%c0_17, %c0_18, %c0_19], %20 {strides = array<i32>} : memref<1x64x256xf32, #tpu.memory_space<vmem>>, vector<1x64x256xf32>,
    return
  }
  func.func @transform_0(%arg0: i32) -> (i32, i32, i32) {
    %c0_i32 = arith.constant 0 : i32
    %c0_i32_0 = arith.constant 0 : i32
    %c0_i32_1 = arith.constant 0 : i32
    return %arg0, %c0_i32, %c0_i32_0 : i32, i32, i32
  }
  func.func @transform_1(%arg0: i32) -> (i32, i32) {
    %c0_i32 = arith.constant 0 : i32
    %c0_i32_0 = arith.constant 0 : i32
    %c0_i32_1 = arith.constant 0 : i32
    return %c0_i32, %c0_i32_0 : i32, i32
  }
  func.func @transform_2(%arg0: i32) -> (i32, i32) {
    %c0_i32 = arith.constant 0 : i32
    %c0_i32_0 = arith.constant 0 : i32
    %c0_i32_1 = arith.constant 0 : i32
    return %c0_i32, %c0_i32_0 : i32, i32
  }
  func.func @transform_3(%arg0: i32) -> (i32, i32) {
    %c0_i32 = arith.constant 0 : i32
    %c0_i32_0 = arith.constant 0 : i32
    %c0_i32_1 = arith.constant 0 : i32
    return %c0_i32, %c0_i32_0 : i32, i32
  }
  func.func @transform_4(%arg0: i32) -> (i32, i32) {
    %c0_i32 = arith.constant 0 : i32
    %c0_i32_0 = arith.constant 0 : i32
    %c0_i32_1 = arith.constant 0 : i32
    return %c0_i32, %c0_i32_0 : i32, i32
  }
  func.func @transform_5(%arg0: i32) -> (i32, i32, i32) {
    %c0_i32 = arith.constant 0 : i32
    %c0_i32_0 = arith.constant 0 : i32
    %c0_i32_1 = arith.constant 0 : i32
    return %arg0, %c0_i32, %c0_i32_0 : i32, i32, i32
  }
}

</mosaic_0001>

<bundles_post_ra>
// kernel: squeeze_excite_pallas.1
= control target key start
LH: loop header
LB: loop body
LE: loop exit
PB: predicated region body
PF: predicated region fallthrough
CT: control target
= control target key end

     0   :  { %s725_s18 = smov 0   ;;  %s875_s0 = inlined_call_operand.vmem [shape: f32[2,64,256], index: 0, kind: input, shape index: {}]   ;;  %s876_s1 = inlined_call_operand.vmem [shape: f32[64,4], index: 1, kind: input, shape index: {}]   ;;  %s877_s2 = inlined_call_operand.vmem [shape: f32[1,4], index: 2, kind: input, shape index: {}]   ;;  %s878_s3 = inlined_call_operand.vmem [shape: f32[4,64], index: 3, kind: input, shape index: {}]   ;;  %s879_s4 = inlined_call_operand.vmem [shape: f32[1,64], index: 4, kind: input, shape index: {}]   ;;  %s880_s5 = inlined_call_operand.vmem [shape: f32[2,64,256], index: 5, kind: output, shape index: {}]  }
   0x1 LB: > { %s619_s19 = sadd.s32 4294967295, %s691_s18   ;;  %p623_p0 = scmp.ge.s32.totalorder %s691_s18, 1  ;;  %s691_s18 = sphi %s725_s18, %s15_s18  }
   0x2   : > { %p187_p1 = scmp.lt.s32.totalorder %s691_s18, 3 }
   0x4   : > { %p188_p2 = pnand %p623_p0, %p187_p1 }
   0x5   : > { %p215_p3 = scmp.lt.s32.totalorder (!%p188_p2), %s619_s19, 1 }
   0x6   : > { %191 = sbr.rel (%p188_p2) target bundleno = 731 (0x2db), region = 40 }
   0xb   : > { %s882_s19 = smov (!%p215_p3, %s619_s19), 1  ;;  %v693_v24 = vmov 0.0   ;;  %v272_v25 = vld [vmem:[%s876_s1 + $0x38] sm:$0xff]  ;;  %v271_v26 = vld [vmem:[%s876_s1 + $0x30] sm:$0xff]  ;;  %v270_v27 = vld [vmem:[%s876_s1 + $0x28] sm:$0xff]  ;;  %vm694_vm0 = vmmov 0   ;;  %v282_v33 = vlaneseq }
   0xc   : > { %s634_s20 = sshll.u32 %s882_s19, 7  ;;  %647 = vmatprep.subr.mxu0 %v693_v24  ;;  %666 = vmatprep.subr.mxu1 %v693_v24  ;;  %v269_v28 = vld [vmem:[%s876_s1 + $0x20] sm:$0xff]  ;;  %v268_v29 = vld [vmem:[%s876_s1 + $0x18] sm:$0xff]  ;;  %v267_v30 = vld [vmem:[%s876_s1 + $0x10] sm:$0xff]  ;;  %vm293_vm1 = vcmask 130112   ;;  %vm300_vm2 = vcmask 195712  }
   0xd   : > { %s219_s23 = scalar_lea.vmem %s875_s0, %s634_s20  ;;  %648 = vmatpush3.msra.mxu0 %v272_v25  ;;  %v266_v31 = vld [vmem:[%s876_s1 + $0x8] sm:$0xff]  ;;  %v265_v32 = vld [vmem:[%s876_s1] sm:$0xff]  ;;  %663 = vmatprep.mubr.msk.f32.mxu0 %vm694_vm0, %v693_v24  ;;  %v283_v34 = vand.u32 127, %v282_v33  ;;  %v813_v35 = vshrl.u32 %v282_v33, 7  ;;  %vm307_vm3 = vcmask 261312   ;;  %vm314_vm4 = vcmask 326912   ;;  %s838_s26 = scalar_lea.vmem %s880_s5, %s634_s20 }
   0xe   : > { %v741_v0 = vld [vmem:[%s219_s23] sm:$0xff]  ;;  %v743_v1 = vld [vmem:[%s219_s23 + $0x8] sm:$0xff]  ;;  %v751_v5 = vld [vmem:[%s219_s23 + $0x10] sm:$0xff]  ;;  %649 = vmatprep.subr.mxu0 %v693_v24  ;;  %668 = vmatprep.mubr.msk.f32.mxu1 %vm694_vm0, %v693_v24  ;;  %vm321_vm5 = vcmask 392512   ;;  %vm328_vm6 = vcmask 458112   ;;  %vm335_vm7 = vcmask 523712  }
   0xf   : > { %v745_v2 = vld [vmem:[%s219_s23 + $0x20] sm:$0xff]  ;;  %v241_v3 = vadd.f32 %v743_v1, %v741_v0  ;;  %v749_v4 = vld [vmem:[%s219_s23 + $0x28] sm:$0xff]  ;;  %v753_v6 = vld [vmem:[%s219_s23 + $0x18] sm:$0xff]  ;;  %650 = vmatpush3.msra.mxu0 %v271_v26  ;;  %v288_v36 = vadd.s32 4294967288, %v283_v34  ;;  %v295_v37 = vadd.s32 4294967280, %v283_v34  ;;  %v302_v38 = vadd.s32 4294967272, %v283_v34 }
  0x10   : > { %v247_v7 = vadd.f32 %v749_v4, %v745_v2  ;;  %v757_v8 = vld [vmem:[%s219_s23 + $0x30] sm:$0xff]  ;;  %v759_v9 = vld [vmem:[%s219_s23 + $0x38] sm:$0xff]  ;;  %v244_v10 = vadd.f32 %v753_v6, %v751_v5  ;;  %v765_v12 = vld [vmem:[%s219_s23 + $0x40] sm:$0xff]  ;;  %651 = vmatprep.subr.mxu0 %v693_v24  ;;  %v286_v40 = vsub.s32 %v283_v34, %v813_v35  ;;  %v309_v43 = vadd.s32 4294967264, %v283_v34 }
  0x11   : > { %242 = vadd.xlane.f32.xlu0 %v241_v3  ;;  %v250_v11 = vadd.f32 %v759_v9, %v757_v8  ;;  %v767_v13 = vld [vmem:[%s219_s23 + $0x48] sm:$0xff]  ;;  %v769_v14 = vld [vmem:[%s219_s23 + $0x50] sm:$0xff]  ;;  %v771_v15 = vld [vmem:[%s219_s23 + $0x58] sm:$0xff]  ;;  %652 = vmatpush3.msra.mxu0 %v270_v27  ;;  %v291_v42 = vsub.s32 %v288_v36, %v813_v35  ;;  %v298_v44 = vsub.s32 %v295_v37, %v813_v35  ;;  %v316_v46 = vadd.s32 4294967256, %v283_v34 }
  0x12   : > { %248 = vadd.xlane.f32.xlu1 %v247_v7  ;;  %v253_v16 = vadd.f32 %v767_v13, %v765_v12  ;;  %v256_v17 = vadd.f32 %v771_v15, %v769_v14  ;;  %v777_v18 = vld [vmem:[%s219_s23 + $0x60] sm:$0xff]  ;;  %v779_v19 = vld [vmem:[%s219_s23 + $0x68] sm:$0xff]  ;;  %v781_v20 = vld [vmem:[%s219_s23 + $0x70] sm:$0xff]  ;;  %653 = vmatprep.subr.mxu0 %v693_v24  ;;  %v305_v45 = vsub.s32 %v302_v38, %v813_v35  ;;  %v323_v52 = vadd.s32 4294967248, %v283_v34 }
  0x13   : > { %v783_v21 = vld [vmem:[%s219_s23 + $0x78] sm:$0xff]  ;;  %v259_v22 = vadd.f32 %v779_v19, %v777_v18  ;;  %654 = vmatpush3.msra.mxu0 %v269_v28  ;;  %v312_v51 = vsub.s32 %v309_v43, %v813_v35  ;;  %v319_v55 = vsub.s32 %v316_v46, %v813_v35  ;;  %v330_v56 = vadd.s32 4294967240, %v283_v34  ;;  %v411_v26 = vld [vmem:[%s878_s3] sm:$0xf] }
  0x14   : > { %v262_v23 = vadd.f32 %v783_v21, %v781_v20  ;;  %655 = vmatprep.subr.mxu0 %v693_v24  ;;  %v326_v63 = vsub.s32 %v323_v52, %v813_v35  ;;  %vm337_vm8 = vcmask 523264   ;;  %vm417_vm9 = vcmask 1043456   ;;  %v273_v27 = vld [vmem:[%s877_s2] sm:$0x1] }
  0x15   : > { %245 = vadd.xlane.f32.xlu0 %v244_v10  ;;  %656 = vmatpush3.msra.mxu0 %v268_v29  ;;  %v333_v7 = vsub.s32 %v330_v56, %v813_v35  ;;  %vm413_vm10 = vcmask 31744  }
  0x16   : > { %251 = vadd.xlane.f32.xlu1 %v250_v11  ;;  %657 = vmatprep.subr.mxu0 %v693_v24 }
  0x17   : > { %658 = vmatpush3.msra.mxu0 %v267_v30  ;;  %667 = vmatpush3.msk.msra.mxu1 %vm417_vm9, %v411_v26 }
  0x18   : > { %659 = vmatprep.subr.mxu0 %v693_v24 }
  0x19   : > { %254 = vadd.xlane.f32.xlu0 %v253_v16  ;;  %660 = vmatpush3.msra.mxu0 %v266_v31 }
  0x1a   : > { %257 = vadd.xlane.f32.xlu1 %v256_v17  ;;  %661 = vmatprep.subr.mxu0 %v693_v24 }
  0x1b   : > { %662 = vmatpush3.msra.mxu0 %v265_v32  ;;  %v412_v32 = vld [vmem:[%s879_s4] sm:$0x1] }
  0x1d   : > { %260 = vadd.xlane.f32.xlu0 %v259_v22 }
  0x1e   : > { %263 = vadd.xlane.f32.xlu1 %v262_v23 }
  0x9a   : > { %v243_v39 = vpop.xlane.xlu0 %242 }
  0x9b   : > { %v249_v41 = vpop.xlane.xlu1 %248  ;;  %v287_v48 = vrot.slane %v243_v39, %v286_v40  ;;  %v499_v40 = vsub.s32 0, %v813_v35 }
  0x9c   : > { %v299_v53 = vrot.slane %v249_v41, %v298_v44 }
  0x9e   : > { %v246_v47 = vpop.xlane.xlu0 %245 }
  0x9f   : > { %v292_v49 = vrot.slane %v246_v47, %v291_v42  ;;  %v252_v50 = vpop.xlane.xlu1 %251 }
  0xa0   : > { %v306_v54 = vrot.slane %v252_v50, %v305_v45 }
  0xa1   : > { %v294_v57 = vsel %vm293_vm1, %v292_v49, %v287_v48 }
  0xa2   : > { %v301_v58 = vsel %vm300_vm2, %v299_v53, %v294_v57  ;;  %v255_v59 = vpop.xlane.xlu0 %254 }
  0xa3   : > { %v308_v60 = vsel %vm307_vm3, %v306_v54, %v301_v58  ;;  %v313_v61 = vrot.slane %v255_v59, %v312_v51  ;;  %v258_v62 = vpop.xlane.xlu1 %257 }
  0xa4   : > { %v320_v3 = vrot.slane %v258_v62, %v319_v55 }
  0xa5   : > { %v315_v10 = vsel %vm314_vm4, %v313_v61, %v308_v60 }
  0xa6   : > { %v261_v11 = vpop.xlane.xlu0 %260  ;;  %v322_v22 = vsel %vm321_vm5, %v320_v3, %v315_v10 }
  0xa7   : > { %v327_v16 = vrot.slane %v261_v11, %v326_v63  ;;  %v264_v17 = vpop.xlane.xlu1 %263 }
  0xa8   : > { %v334_v23 = vrot.slane %v264_v17, %v333_v7 }
  0xa9   : > { %v329_v24 = vsel %vm328_vm6, %v327_v16, %v322_v22 }
  0xaa   : > { %v336_v25 = vsel %vm335_vm7, %v334_v23, %v329_v24 }
  0xab   : > { %664 = vmatmul.mubr.msk.f32.vlgmr.msra.gmra.mxu0 %vm337_vm8, %v336_v25 }
 0x16b   : > { %v406_v28 = vpop.f32.mrf.mxu0 }
 0x16c   : > { %v407_v29 = vadd.f32 %v406_v28, %v273_v27 }
 0x16d   : > { %v665_v30 = vpop.f32.mrf.mxu0 }
 0x16e   : > { %v410_v31 = vmax.f32 %v407_v29, 0.0 }
 0x170   : > { %669 = vmatmul.mubr.msk.f32.vlgmr.msra.gmra.mxu1 %vm413_vm10, %v410_v31 }
 0x230   : > { %v487_v33 = vpop.f32.mrf.mxu1 }
 0x231   : > { %v488_v34 = vadd.f32 %v487_v33, %v412_v32 }
 0x232   : > { %v670_v36 = vpop.f32.mrf.mxu1 }
 0x233   : > { %v631_v37 = vmul.f32 -1.442695, %v488_v34 }
 0x235   : > { %681 = vpow2.f32 %v631_v37 }
 0x242   : > { %v682_v38 = vpop.eup %681 }
 0x243   : > { %v494_v39 = vadd.f32 1.0, %v682_v38 }
 0x245   : > { %683 = vrcp.f32 %v494_v39 }
 0x252   : > { %v684_v41 = vpop.eup %683 }
 0x253   : > { %v500_v42 = vrot.slane %v684_v41, %v499_v40 }
 0x255   : > { %506 = vbcast.lane.b32.xlu1 %v500_v42, 264  ;;  %502 = vbcast.lane.b32.xlu0 %v500_v42, 256 }
 0x259   : > { %510 = vbcast.lane.b32.xlu1 %v500_v42, 272  ;;  %518 = vbcast.lane.b32.xlu0 %v500_v42, 288 }
 0x25d   : > { %514 = vbcast.lane.b32.xlu1 %v500_v42, 280  ;;  %526 = vbcast.lane.b32.xlu0 %v500_v42, 304 }
 0x261   : > { %522 = vbcast.lane.b32.xlu1 %v500_v42, 296 }
 0x265   : > { %530 = vbcast.lane.b32.xlu1 %v500_v42, 312 }
 0x2c7   : > { %v507_v35 = vpop.permute.xlu1 %506  ;;  %v503_v43 = vpop.permute.xlu0 %502 }
 0x2c8   : > { %v534_v44 = vmul.f32 %v507_v35, %v751_v5  ;;  %v535_v45 = vmul.f32 %v507_v35, %v753_v6  ;;  %v532_v46 = vmul.f32 %v503_v43, %v741_v0  ;;  %v533_v47 = vmul.f32 %v503_v43, %v743_v1 }
 0x2ca   : > { %550 = vst [vmem:[%s838_s26 + $0x10] sm:$0xff] %v534_v44  ;;  %551 = vst [vmem:[%s838_s26 + $0x18] sm:$0xff] %v535_v45 }
 0x2cb   : > { %548 = vst [vmem:[%s838_s26] sm:$0xff] %v532_v46  ;;  %549 = vst [vmem:[%s838_s26 + $0x8] sm:$0xff] %v533_v47  ;;  %v511_v48 = vpop.permute.xlu1 %510  ;;  %v519_v49 = vpop.permute.xlu0 %518 }
 0x2cc   : > { %v536_v50 = vmul.f32 %v511_v48, %v745_v2  ;;  %v537_v5 = vmul.f32 %v511_v48, %v749_v4  ;;  %v540_v6 = vmul.f32 %v519_v49, %v765_v12  ;;  %v541_v0 = vmul.f32 %v519_v49, %v767_v13 }
 0x2ce   : > { %552 = vst [vmem:[%s838_s26 + $0x20] sm:$0xff] %v536_v50  ;;  %553 = vst [vmem:[%s838_s26 + $0x28] sm:$0xff] %v537_v5 }
 0x2cf   : > { %556 = vst [vmem:[%s838_s26 + $0x40] sm:$0xff] %v540_v6  ;;  %557 = vst [vmem:[%s838_s26 + $0x48] sm:$0xff] %v541_v0  ;;  %v515_v1 = vpop.permute.xlu1 %514  ;;  %v527_v51 = vpop.permute.xlu0 %526 }
 0x2d0   : > { %v538_v52 = vmul.f32 %v515_v1, %v757_v8  ;;  %v539_v2 = vmul.f32 %v515_v1, %v759_v9  ;;  %v544_v4 = vmul.f32 %v527_v51, %v777_v18  ;;  %v545_v12 = vmul.f32 %v527_v51, %v779_v19 }
 0x2d2   : > { %554 = vst [vmem:[%s838_s26 + $0x30] sm:$0xff] %v538_v52  ;;  %555 = vst [vmem:[%s838_s26 + $0x38] sm:$0xff] %v539_v2 }
 0x2d3   : > { %560 = vst [vmem:[%s838_s26 + $0x60] sm:$0xff] %v544_v4  ;;  %561 = vst [vmem:[%s838_s26 + $0x68] sm:$0xff] %v545_v12  ;;  %v523_v13 = vpop.permute.xlu1 %522 }
 0x2d4   : > { %v542_v53 = vmul.f32 %v523_v13, %v769_v14  ;;  %v543_v54 = vmul.f32 %v523_v13, %v771_v15 }
 0x2d6   : > { %558 = vst [vmem:[%s838_s26 + $0x50] sm:$0xff] %v542_v53  ;;  %559 = vst [vmem:[%s838_s26 + $0x58] sm:$0xff] %v543_v54 }
 0x2d7   : > { %v531_v8 = vpop.permute.xlu1 %530 }
 0x2d8   : > { %v546_v55 = vmul.f32 %v531_v8, %v781_v20  ;;  %v547_v9 = vmul.f32 %v531_v8, %v783_v21 }
 0x2da   : > { %562 = vst [vmem:[%s838_s26 + $0x70] sm:$0xff] %v546_v55  ;;  %563 = vst [vmem:[%s838_s26 + $0x78] sm:$0xff] %v547_v9 }
 0x2db PF: > { %s15_s18 = sadd.s32 1, %s691_s18  }
 0x2dc   : > { %p12_p4 = scmp.ge.s32.totalorder %s15_s18, 4  }
 0x2de   :  { %14 = sbr.rel (!%p12_p4) target bundleno = 1 (0x1), region = 70 }

</bundles_post_ra>
